<compile_context>
chip_gen: v7x
topology: tpu7x:2x2x1
jax: 0.10.0
libtpu: 0.0.40
codegen_flags: <defaults>
</compile_context>

<pallas_src>
import functools

import jax
import jax.numpy as jnp
from jax.experimental import pallas as pl
from jax.experimental.pallas import tpu as pltpu

LANES = 128
MIN_PALLAS_ELEMS = 16 * 1024      # below this, a fused jnp elementwise is cheaper
SINGLE_BLOCK_MAX_ROWS = 1024      # <= 0.5 MiB f32: one full-array block is fine
MIB = 1 << 20


def _round_up(x: int, m: int) -> int:
    return ((x + m - 1) // m) * m


def _sublanes_for(dtype) -> int:
    # 8 sublanes per vreg for 32-bit, 16 for 16-bit, 32 for 8-bit dtypes.
    bits = jnp.dtype(dtype).itemsize * 8
    return max(8, 256 // bits)


@functools.lru_cache(maxsize=1)
def _default_block_rows() -> int:
    """Generation-specific tile height (rows of 128 lanes)."""
    try:
        kind = jax.devices()[0].device_kind.lower()
    except Exception:
        return 8192
    if "v5e" in kind or "v5 lite" in kind or "v5lite" in kind:
        return 4096       # ~0.82 TB/s HBM; 16 MiB default scoped VMEM -> keep small
    if "v7" in kind:
        return 16384      # ~3.2 TB/s HBM; amortize the ~0.35 us/step fixed cost
    return 8192           # v6e and other generations


def _horner_f32(xf, coefs_f32):
    """Horner evaluation in f32; coefficients highest power first."""
    ncoef = coefs_f32.shape[0]
    if ncoef == 1:
        return jnp.full(xf.shape, coefs_f32[0], dtype=jnp.float32)
    acc = xf * coefs_f32[0] + coefs_f32[1]      # first step folded into init
    for i in range(2, ncoef):
        acc = acc * xf + coefs_f32[i]
    return acc


def _poly_jnp(x, coefs_f32):
    """Plain-XLA fallback for tiny inputs (fuses with neighbors)."""
    return _horner_f32(x.astype(jnp.float32), coefs_f32).astype(x.dtype)


def _poly_kernel(coef_ref, x_ref, o_ref):
    # coef_ref: SMEM (degree+1,) f32, highest power first.
    # x_ref / o_ref: VMEM tiles (block_rows, 128).
    x = x_ref[...].astype(jnp.float32)
    ncoef = coef_ref.shape[0]
    if ncoef == 1:
        acc = jnp.full(x.shape, coef_ref[0], dtype=jnp.float32)
    else:
        acc = x * coef_ref[0] + coef_ref[1]     # fold first Horner step into init
        for i in range(2, ncoef):
            acc = acc * x + coef_ref[i]
    # TODO(synk): for very high degree (ncoef >= ~16) split into even/odd Horner
    # chains on x*x to break the serial VALU dependency; unnecessary at degree 3.
    o_ref[...] = acc.astype(o_ref.dtype)


def vectorized_poly1d(x: jax.Array, coefficients, block_rows: int | None = None) -> jax.Array:
    """Evaluate the polynomial elementwise on x (any shape, any float dtype)."""
    orig_shape = x.shape
    orig_dtype = x.dtype
    coefs = jnp.asarray(coefficients, dtype=jnp.float32)

    if coefs.shape[0] == 0:
        return jnp.zeros_like(x)

    flat = x.reshape(-1)
    n = flat.shape[0]

    # Small / empty inputs: pallas_call launch + DMA setup dominates -> plain jnp.
    if n < MIN_PALLAS_ELEMS:
        return _poly_jnp(x, coefs)

    # Ragged numel (rare for this use case): pad to a lane multiple.  Aligned
    # inputs (n % 128 == 0) take the zero-copy path: reshape only.
    n_pad = (-n) % LANES
    if n_pad:
        flat = jnp.pad(flat, (0, n_pad))
    rows = (n + n_pad) // LANES
    slab = flat.reshape(rows, LANES)

    sub = _sublanes_for(orig_dtype)
    itemsize = jnp.dtype(orig_dtype).itemsize

    if block_rows is None:
        block_rows = _default_block_rows()
    # Cap block so double-buffered in+out stays well under scoped VMEM everywhere.
    cap_rows = max(sub, ((40 * MIB) // (4 * LANES * itemsize)) // sub * sub)
    max_br = min(_round_up(block_rows, sub), cap_rows)

    if rows <= SINGLE_BLOCK_MAX_ROWS:
        br = rows                      # single full-array block: always legal
    else:
        # >= 4 steps, even count: lets v7x's two TensorCores each take a
        # "parallel" share and gives DMA/compute pipelining work to overlap.
        steps = max(4, pl.cdiv(rows, max_br))
        steps += steps % 2
        br = min(_round_up(pl.cdiv(rows, steps), sub), max_br)
    grid = (pl.cdiv(rows, br),)        # ragged last block is masked by Pallas

    vmem_need = 4 * br * LANES * itemsize                  # in + out, double-buffered
    vmem_limit = int(min(48 * MIB, max(2 * vmem_need, 16 * MIB)))

    out = pl.pallas_call(
        _poly_kernel,
        out_shape=jax.ShapeDtypeStruct((rows, LANES), orig_dtype),
        grid=grid,
        in_specs=[
            pl.BlockSpec(memory_space=pltpu.MemorySpace.SMEM),   # coefficients
            pl.BlockSpec((br, LANES), lambda i: (i, 0)),         # x slab tile
        ],
        out_specs=pl.BlockSpec((br, LANES), lambda i: (i, 0)),
        compiler_params=pltpu.CompilerParams(
            dimension_semantics=("parallel",),
            vmem_limit_bytes=vmem_limit),
    )(coefs, slab)

    if n_pad:
        # TODO(synk): avoid this slice (and the pad above) for large unaligned
        # inputs, e.g. via a separate 1-D tail kernel; aligned inputs never pay it.
        return out.reshape(-1)[:n].reshape(orig_shape)
    return out.reshape(orig_shape)


def _reference_f32(x, coefficients):
    """Direct port of the PyTorch forward (sum of c_i * x**(degree-i)) in f32."""
    xf = x.astype(jnp.float32)
    cf = coefficients.astype(jnp.float32)
    degree = cf.shape[0] - 1
    result = jnp.zeros_like(xf)
    for i in range(cf.shape[0]):
        result = result + cf[i] * xf ** (degree - i)
    return result


if __name__ == "__main__":
    key = jax.random.PRNGKey(0)
    k1, k2, k3, k4, k5, k6 = jax.random.split(key, 6)

    # 1) Primary spec case: small NCHW f32 tensor, degree-3 polynomial (bypass path).
    x1 = jax.random.normal(k1, (2, 4, 16, 16), dtype=jnp.float32)
    c1 = jax.random.normal(k2, (4,), dtype=jnp.float32)
    y1 = vectorized_poly1d(x1, c1)
    jax.block_until_ready(y1)
    assert y1.shape == x1.shape and y1.dtype == x1.dtype
    assert jnp.allclose(y1, _reference_f32(x1, c1), atol=1e-4, rtol=1e-5), "case1 mismatch"

    # 2) Aligned numel, single-block Pallas path.
    x2 = jax.random.normal(k3, (2, 4, 64, 64), dtype=jnp.float32)
    y2 = vectorized_poly1d(x2, c1)
    jax.block_until_ready(y2)
    assert jnp.allclose(y2, _reference_f32(x2, c1), atol=1e-4, rtol=1e-5), "case2 mismatch"

    # 3) Aligned numel, multi-step "parallel" grid with masked partial last block.
    x3 = jax.random.normal(k4, (2, 8, 96, 100), dtype=jnp.float32)
    y3 = vectorized_poly1d(x3, c1)
    jax.block_until_ready(y3)
    assert jnp.allclose(y3, _reference_f32(x3, c1), atol=1e-4, rtol=1e-5), "case3 mismatch"

    # 4) Ragged numel (pad fallback) + bf16 input (f32 compute inside the kernel).
    x4 = jax.random.normal(k5, (3, 5, 33, 35), dtype=jnp.float32).astype(jnp.bfloat16)
    c4 = jax.random.normal(k6, (3,), dtype=jnp.float32)
    y4 = vectorized_poly1d(x4, c4)
    jax.block_until_ready(y4)
    assert y4.shape == x4.shape and y4.dtype == x4.dtype
    y4_ref = _reference_f32(x4, c4).astype(jnp.bfloat16)
    assert jnp.allclose(y4.astype(jnp.float32), y4_ref.astype(jnp.float32),
                        atol=3e-2, rtol=3e-2), "case4 mismatch"

    print("KERNEL_OK")
</pallas_src>

<mosaic_0001>
module attributes {stable_mosaic.version = 11 : i64} {
  func.func @_poly_kernel(%arg0: i32, %arg1: memref<4xf32, #tpu.memory_space<smem>>, %arg2: memref<256x128xf32, #tpu.memory_space<vmem>>, %arg3: memref<256x128xf32, #tpu.memory_space<vmem>>) attributes {dimension_semantics = [#tpu.dimension_semantics<parallel>], iteration_bounds = array<i64: 1>, scalar_prefetch = 0 : i64, scratch_operands = 0 : i64, tpu.core_type = #tpu.core_type<tc>, window_params = [{transform_indices = @transform_0, window_bounds = array<i64: 4>}, {transform_indices = @transform_1, window_bounds = array<i64: 256, 128>}, {transform_indices = @transform_2, window_bounds = array<i64: 256, 128>}]} {
    %c0 = arith.constant 0 : index
    %c0_0 = arith.constant 0 : index
    %0 = vector.load %arg2[%c0, %c0_0] : memref<256x128xf32, #tpu.memory_space<vmem>>, vector<256x128xf32>
    %c0_1 = arith.constant 0 : index
    %1 = memref.load %arg1[%c0_1] : memref<4xf32, #tpu.memory_space<smem>>
    %2 = vector.broadcast %1 : f32 to vector<256x128xf32>
    %3 = arith.mulf %0, %2 : vector<256x128xf32>
    %c1 = arith.constant 1 : index
    %4 = memref.load %arg1[%c1] : memref<4xf32, #tpu.memory_space<smem>>
    %5 = vector.broadcast %4 : f32 to vector<256x128xf32>
    %6 = arith.addf %3, %5 : vector<256x128xf32>
    %7 = arith.mulf %6, %0 : vector<256x128xf32>
    %c2 = arith.constant 2 : index
    %8 = memref.load %arg1[%c2] : memref<4xf32, #tpu.memory_space<smem>>
    %9 = vector.broadcast %8 : f32 to vector<256x128xf32>
    %10 = arith.addf %7, %9 : vector<256x128xf32>
    %11 = arith.mulf %10, %0 : vector<256x128xf32>
    %c3 = arith.constant 3 : index
    %12 = memref.load %arg1[%c3] : memref<4xf32, #tpu.memory_space<smem>>
    %13 = vector.broadcast %12 : f32 to vector<256x128xf32>
    %14 = arith.addf %11, %13 : vector<256x128xf32>
    %c0_2 = arith.constant 0 : index
    %c0_3 = arith.constant 0 : index
    %15 = vector.load %arg3[%c0_2, %c0_3] : memref<256x128xf32, #tpu.memory_space<vmem>>, vector<256x128xf32>
    tpu.vector_store %arg3[%c0_2, %c0_3], %14 {strides = array<i32>} : memref<256x128xf32, #tpu.memory_space<vmem>>, vector<256x128xf32>,
    return
  }
  func.func @transform_0(%arg0: i32) -> i32 {
    %c0_i32 = arith.constant 0 : i32
    %c0_i32_0 = arith.constant 0 : i32
    return %c0_i32 : i32
  }
  func.func @transform_1(%arg0: i32) -> (i32, i32) {
    %c0_i32 = arith.constant 0 : i32
    %c0_i32_0 = arith.constant 0 : i32
    return %arg0, %c0_i32 : i32, i32
  }
  func.func @transform_2(%arg0: i32) -> (i32, i32) {
    %c0_i32 = arith.constant 0 : i32
    %c0_i32_0 = arith.constant 0 : i32
    return %arg0, %c0_i32 : i32, i32
  }
}

</mosaic_0001>

<bundles_post_ra>
// kernel: tpu_custom_call.1
= control target key start
LH: loop header
LB: loop body
LE: loop exit
PB: predicated region body
PF: predicated region fallthrough
CT: control target
= control target key end

     0   :  { %7 = vsyncpa [#allocation5], 0  ;;  %s585_s0 = inlined_call_operand.hbm [shape: f32[4], index: 0, kind: input, shape index: {}]   ;;  %s586_s1 = inlined_call_operand.hbm [shape: f32[256,128], index: 1, kind: input, shape index: {}]   ;;  %s587_s2 = inlined_call_operand.hbm [shape: f32[256,128], index: 2, kind: output, shape index: {}]  }
   0x1   :  { %8 = vsyncpa [#allocation3], 0 }
   0x2   :  { %9 = vsyncpa [#allocation4], 0  ;;  %s327_s11 = scalar_lea.hbm %s585_s0, 16 }
   0x3   :  { %p328_p0 = scmp.ne.s32.totalorder %s585_s0, %s327_s11  ;;  %p331_p1 = scmp.lt.u32.totalorder %s327_s11, %s585_s0 }
   0x5   :  { %p333_p2 = pnand %p331_p1, %p328_p0 }
   0x7   :  { %336 = shalt.err (!%p333_p2)
}
   0x8   :  { %s387_s16 = smov [#allocation2]   ;;  %s388_s19 = smov [#allocation6]  }
   0x9   :  { %17 = dma.hbm_to_smem %s585_s0, 16, %s387_s16, [#allocation5]  }
   0xa   :  { %s23_s20 = sshll.u32 %s388_s19, 4  ;;  %s337_s23 = scalar_lea.hbm %s586_s1, 4096  ;;  %s24_s20 = int_to_ptr.vmem [resolvable:$true] %s23_s20 }
   0xb   :  { %p338_p3 = scmp.ne.s32.totalorder %s586_s1, %s337_s23  ;;  %p341_p4 = scmp.lt.u32.totalorder %s337_s23, %s586_s1 }
   0xd   :  { %p343_p5 = pnand %p341_p4, %p338_p3 }
   0xf   :  { %346 = shalt.err (!%p343_p5)
}
  0x10   :  { %s347_s28 = scalar_lea.vmem %s24_s20, 4096  ;;  %p352_p7 = scmp.lt.s32.totalorder %s24_s20, %s24_s20 }
  0x11   :  { %p348_p6 = scmp.ne.s32.totalorder %s24_s20, %s347_s28  ;;  %p353_p8 = scmp.lt.s32.totalorder %s347_s28, %s347_s28 }
  0x13   :  { %p354_p9 = por %p353_p8, %p352_p7 }
  0x15   :  { %p355_p10 = pnand %p354_p9, %p348_p6 }
  0x17   :  { %358 = shalt.err (!%p355_p10)
}
  0x18   :  { %s389_s0 = smov 128   ;;  %s390_s29 = smov 8  }
  0x19   :  { %29 = dma.hbm_to_vmem [thread:$0]  %s586_s1, 4096, %s24_s20, [#allocation3], %s389_s0, %s389_s0, %s390_s29  }
  0x1a   :  { %381 = dma.done.wait [#allocation5], 16  }
  0x1b   :  { %382 = vsyncadd [#allocation5], 4294967280 }
  0x1c   :  { %383 = dma.done.wait [#allocation3], 4096  }
  0x1d   :  { %384 = vsyncadd [#allocation3], 4294963200 }
  0x1e   :  { %36 = sfence }
  0x1f   :  { %s69_s4 = sld [smem:[#allocation2]]  ;;  %s319_s5 = sld [smem:[#allocation2 + $0x1]]  ;;  %v37_v0 = vld [vmem:[#allocation6] sm:$0xff]  ;;  %v38_v1 = vld [vmem:[#allocation6 + $0x8] sm:$0xff]  ;;  %v39_v2 = vld [vmem:[#allocation6 + $0x10] sm:$0xff] }
  0x20   :  { %s320_s6 = sld [smem:[#allocation2 + $0x2]]  ;;  %s321_s7 = sld [smem:[#allocation2 + $0x3]]  ;;  %v40_v3 = vld [vmem:[#allocation6 + $0x18] sm:$0xff]  ;;  %v41_v4 = vld [vmem:[#allocation6 + $0x20] sm:$0xff]  ;;  %v42_v5 = vld [vmem:[#allocation6 + $0x28] sm:$0xff] }
  0x21   :  { %v43_v8 = vld [vmem:[#allocation6 + $0x30] sm:$0xff]  ;;  %v44_v9 = vld [vmem:[#allocation6 + $0x38] sm:$0xff]  ;;  %v45_v50 = vld [vmem:[#allocation6 + $0x40] sm:$0xff]  ;;  %s391_s1 = smov [#allocation7]  }
  0x22   :  { %v46_v51 = vld [vmem:[#allocation6 + $0x48] sm:$0xff]  ;;  %v47_v52 = vld [vmem:[#allocation6 + $0x50] sm:$0xff]  ;;  %v48_v57 = vld [vmem:[#allocation6 + $0x58] sm:$0xff]  ;;  %s306_s8 = sshll.u32 %s391_s1, 4  ;;  %s307_s8 = int_to_ptr.vmem [resolvable:$true] %s306_s8 }
  0x23   :  { %v49_v58 = vld [vmem:[#allocation6 + $0x60] sm:$0xff]  ;;  %v50_v59 = vld [vmem:[#allocation6 + $0x68] sm:$0xff]  ;;  %s359_s9 = scalar_lea.vmem %s307_s8, 4096  ;;  %p364_p12 = scmp.lt.s32.totalorder %s307_s8, %s307_s8 }
  0x24   :  { %p360_p11 = scmp.ne.s32.totalorder %s307_s8, %s359_s9  ;;  %p365_p13 = scmp.lt.s32.totalorder %s359_s9, %s359_s9 }
  0x25   :  { %v434_v6 = vstv %s69_s4  ;;  %v436_v7 = vstv %s319_s5 }
  0x26   :  { %v71_v10 = vmul.f32 %v434_v6, %v37_v0  ;;  %v439_v11 = vstv %s320_s6  ;;  %v441_v12 = vstv %s321_s7  ;;  %v72_v13 = vmul.f32 %v434_v6, %v38_v1  ;;  %p366_p0 = por %p365_p13, %p364_p12 }
  0x27   :  { %v73_v14 = vmul.f32 %v434_v6, %v39_v2  ;;  %v74_v15 = vmul.f32 %v434_v6, %v40_v3  ;;  %v75_v16 = vmul.f32 %v434_v6, %v41_v4  ;;  %v76_v17 = vmul.f32 %v434_v6, %v42_v5 }
  0x28   :  { %v105_v18 = vadd.f32 %v436_v7, %v71_v10  ;;  %v106_v19 = vadd.f32 %v436_v7, %v72_v13  ;;  %v77_v20 = vmul.f32 %v434_v6, %v43_v8  ;;  %v78_v21 = vmul.f32 %v434_v6, %v44_v9  ;;  %p367_p1 = pnand %p366_p0, %p360_p11 }
  0x29   :  { %v107_v22 = vadd.f32 %v436_v7, %v73_v14  ;;  %v108_v23 = vadd.f32 %v436_v7, %v74_v15  ;;  %v109_v24 = vadd.f32 %v436_v7, %v75_v16  ;;  %v110_v25 = vadd.f32 %v436_v7, %v76_v17 }
  0x2a   :  { %v137_v26 = vmul.f32 %v105_v18, %v37_v0  ;;  %v138_v27 = vmul.f32 %v106_v19, %v38_v1  ;;  %v111_v28 = vadd.f32 %v436_v7, %v77_v20  ;;  %v112_v29 = vadd.f32 %v436_v7, %v78_v21 }
  0x2b   :  { %v139_v30 = vmul.f32 %v107_v22, %v39_v2  ;;  %v140_v31 = vmul.f32 %v108_v23, %v40_v3  ;;  %v141_v32 = vmul.f32 %v109_v24, %v41_v4  ;;  %v142_v33 = vmul.f32 %v110_v25, %v42_v5 }
  0x2c   :  { %v171_v34 = vadd.f32 %v439_v11, %v137_v26  ;;  %v172_v35 = vadd.f32 %v439_v11, %v138_v27  ;;  %v143_v36 = vmul.f32 %v111_v28, %v43_v8  ;;  %v144_v37 = vmul.f32 %v112_v29, %v44_v9 }
  0x2d   :  { %v173_v38 = vadd.f32 %v439_v11, %v139_v30  ;;  %v174_v39 = vadd.f32 %v439_v11, %v140_v31  ;;  %v175_v40 = vadd.f32 %v439_v11, %v141_v32  ;;  %v176_v41 = vadd.f32 %v439_v11, %v142_v33 }
  0x2e   :  { %v203_v42 = vmul.f32 %v171_v34, %v37_v0  ;;  %v204_v43 = vmul.f32 %v172_v35, %v38_v1  ;;  %v177_v44 = vadd.f32 %v439_v11, %v143_v36  ;;  %v178_v45 = vadd.f32 %v439_v11, %v144_v37  ;;  %v51_v0 = vld [vmem:[#allocation6 + $0x70] sm:$0xff]  ;;  %v52_v1 = vld [vmem:[#allocation6 + $0x78] sm:$0xff] }
  0x2f   :  { %v205_v46 = vmul.f32 %v173_v38, %v39_v2  ;;  %v206_v47 = vmul.f32 %v174_v39, %v40_v3  ;;  %v207_v48 = vmul.f32 %v175_v40, %v41_v4  ;;  %v208_v49 = vmul.f32 %v176_v41, %v42_v5 }
  0x30   :  { %v237_v53 = vadd.f32 %v441_v12, %v203_v42  ;;  %v238_v54 = vadd.f32 %v441_v12, %v204_v43  ;;  %v209_v55 = vmul.f32 %v177_v44, %v43_v8  ;;  %v210_v56 = vmul.f32 %v178_v45, %v44_v9 }
  0x31   :  { %v239_v60 = vadd.f32 %v441_v12, %v205_v46  ;;  %v240_v61 = vadd.f32 %v441_v12, %v206_v47  ;;  %v241_v62 = vadd.f32 %v441_v12, %v207_v48  ;;  %v242_v63 = vadd.f32 %v441_v12, %v208_v49  ;;  %v53_v46 = vld [vmem:[#allocation6 + $0x80] sm:$0xff]  ;;  %v54_v47 = vld [vmem:[#allocation6 + $0x88] sm:$0xff]  ;;  %v55_v48 = vld [vmem:[#allocation6 + $0x90] sm:$0xff] }
  0x32   :  { %269 = vst [vmem:[#allocation7] sm:$0xff] %v237_v53  ;;  %270 = vst [vmem:[#allocation7 + $0x8] sm:$0xff] %v238_v54  ;;  %v243_v2 = vadd.f32 %v441_v12, %v209_v55  ;;  %v244_v3 = vadd.f32 %v441_v12, %v210_v56  ;;  %v79_v4 = vmul.f32 %v434_v6, %v45_v50  ;;  %v56_v56 = vld [vmem:[#allocation6 + $0x98] sm:$0xff] }
  0x33   :  { %v80_v5 = vmul.f32 %v434_v6, %v46_v51  ;;  %271 = vst [vmem:[#allocation7 + $0x10] sm:$0xff] %v239_v60  ;;  %272 = vst [vmem:[#allocation7 + $0x18] sm:$0xff] %v240_v61  ;;  %v81_v8 = vmul.f32 %v434_v6, %v47_v52  ;;  %v82_v9 = vmul.f32 %v434_v6, %v48_v57 }
  0x34   :  { %273 = vst [vmem:[#allocation7 + $0x20] sm:$0xff] %v241_v62  ;;  %274 = vst [vmem:[#allocation7 + $0x28] sm:$0xff] %v242_v63  ;;  %v83_v10 = vmul.f32 %v434_v6, %v49_v58  ;;  %v84_v13 = vmul.f32 %v434_v6, %v50_v59  ;;  %v113_v14 = vadd.f32 %v436_v7, %v79_v4 }
  0x35   :  { %275 = vst [vmem:[#allocation7 + $0x30] sm:$0xff] %v243_v2  ;;  %276 = vst [vmem:[#allocation7 + $0x38] sm:$0xff] %v244_v3  ;;  %v114_v15 = vadd.f32 %v436_v7, %v80_v5  ;;  %v85_v16 = vmul.f32 %v434_v6, %v51_v0  ;;  %v86_v17 = vmul.f32 %v434_v6, %v52_v1 }
  0x36   :  { %v115_v18 = vadd.f32 %v436_v7, %v81_v8  ;;  %v116_v19 = vadd.f32 %v436_v7, %v82_v9  ;;  %v117_v20 = vadd.f32 %v436_v7, %v83_v10  ;;  %v118_v21 = vadd.f32 %v436_v7, %v84_v13 }
  0x37   :  { %v145_v22 = vmul.f32 %v113_v14, %v45_v50  ;;  %v146_v23 = vmul.f32 %v114_v15, %v46_v51  ;;  %v119_v24 = vadd.f32 %v436_v7, %v85_v16  ;;  %v120_v25 = vadd.f32 %v436_v7, %v86_v17 }
  0x38   :  { %v147_v26 = vmul.f32 %v115_v18, %v47_v52  ;;  %v148_v27 = vmul.f32 %v116_v19, %v48_v57  ;;  %v149_v28 = vmul.f32 %v117_v20, %v49_v58  ;;  %v150_v29 = vmul.f32 %v118_v21, %v50_v59 }
  0x39   :  { %v179_v30 = vadd.f32 %v439_v11, %v145_v22  ;;  %v180_v31 = vadd.f32 %v439_v11, %v146_v23  ;;  %v151_v32 = vmul.f32 %v119_v24, %v51_v0  ;;  %v152_v33 = vmul.f32 %v120_v25, %v52_v1 }
  0x3a   :  { %v181_v34 = vadd.f32 %v439_v11, %v147_v26  ;;  %v182_v35 = vadd.f32 %v439_v11, %v148_v27  ;;  %v183_v36 = vadd.f32 %v439_v11, %v149_v28  ;;  %v184_v37 = vadd.f32 %v439_v11, %v150_v29 }
  0x3b   :  { %v211_v38 = vmul.f32 %v179_v30, %v45_v50  ;;  %v212_v39 = vmul.f32 %v180_v31, %v46_v51  ;;  %v185_v40 = vadd.f32 %v439_v11, %v151_v32  ;;  %v186_v41 = vadd.f32 %v439_v11, %v152_v33  ;;  %v57_v50 = vld [vmem:[#allocation6 + $0xa0] sm:$0xff]  ;;  %v58_v51 = vld [vmem:[#allocation6 + $0xa8] sm:$0xff] }
  0x3c   :  { %v213_v42 = vmul.f32 %v181_v34, %v47_v52  ;;  %v214_v43 = vmul.f32 %v182_v35, %v48_v57  ;;  %v215_v44 = vmul.f32 %v183_v36, %v49_v58  ;;  %v216_v45 = vmul.f32 %v184_v37, %v50_v59  ;;  %v59_v58 = vld [vmem:[#allocation6 + $0xb0] sm:$0xff]  ;;  %v60_v59 = vld [vmem:[#allocation6 + $0xb8] sm:$0xff] }
  0x3d   :  { %v245_v49 = vadd.f32 %v441_v12, %v211_v38  ;;  %v246_v53 = vadd.f32 %v441_v12, %v212_v39  ;;  %v217_v54 = vmul.f32 %v185_v40, %v51_v0  ;;  %v218_v55 = vmul.f32 %v186_v41, %v52_v1 }
  0x3e   :  { %v247_v60 = vadd.f32 %v441_v12, %v213_v42  ;;  %v248_v61 = vadd.f32 %v441_v12, %v214_v43  ;;  %v249_v52 = vadd.f32 %v441_v12, %v215_v44  ;;  %v250_v57 = vadd.f32 %v441_v12, %v216_v45  ;;  %v61_v42 = vld [vmem:[#allocation6 + $0xc0] sm:$0xff]  ;;  %v62_v43 = vld [vmem:[#allocation6 + $0xc8] sm:$0xff]  ;;  %v63_v44 = vld [vmem:[#allocation6 + $0xd0] sm:$0xff] }
  0x3f   :  { %277 = vst [vmem:[#allocation7 + $0x40] sm:$0xff] %v245_v49  ;;  %278 = vst [vmem:[#allocation7 + $0x48] sm:$0xff] %v246_v53  ;;  %v251_v62 = vadd.f32 %v441_v12, %v217_v54  ;;  %v252_v63 = vadd.f32 %v441_v12, %v218_v55  ;;  %v87_v0 = vmul.f32 %v434_v6, %v53_v46  ;;  %v64_v55 = vld [vmem:[#allocation6 + $0xd8] sm:$0xff] }
  0x40   :  { %v88_v1 = vmul.f32 %v434_v6, %v54_v47  ;;  %279 = vst [vmem:[#allocation7 + $0x50] sm:$0xff] %v247_v60  ;;  %280 = vst [vmem:[#allocation7 + $0x58] sm:$0xff] %v248_v61  ;;  %v89_v2 = vmul.f32 %v434_v6, %v55_v48  ;;  %v90_v3 = vmul.f32 %v434_v6, %v56_v56 }
  0x41   :  { %281 = vst [vmem:[#allocation7 + $0x60] sm:$0xff] %v249_v52  ;;  %282 = vst [vmem:[#allocation7 + $0x68] sm:$0xff] %v250_v57  ;;  %v91_v4 = vmul.f32 %v434_v6, %v57_v50  ;;  %v92_v5 = vmul.f32 %v434_v6, %v58_v51  ;;  %v121_v8 = vadd.f32 %v436_v7, %v87_v0 }
  0x42   :  { %283 = vst [vmem:[#allocation7 + $0x70] sm:$0xff] %v251_v62  ;;  %284 = vst [vmem:[#allocation7 + $0x78] sm:$0xff] %v252_v63  ;;  %v122_v9 = vadd.f32 %v436_v7, %v88_v1  ;;  %v93_v10 = vmul.f32 %v434_v6, %v59_v58  ;;  %v94_v13 = vmul.f32 %v434_v6, %v60_v59 }
  0x43   :  { %v123_v14 = vadd.f32 %v436_v7, %v89_v2  ;;  %v124_v15 = vadd.f32 %v436_v7, %v90_v3  ;;  %v125_v16 = vadd.f32 %v436_v7, %v91_v4  ;;  %v126_v17 = vadd.f32 %v436_v7, %v92_v5 }
  0x44   :  { %v153_v18 = vmul.f32 %v121_v8, %v53_v46  ;;  %v154_v19 = vmul.f32 %v122_v9, %v54_v47  ;;  %v127_v20 = vadd.f32 %v436_v7, %v93_v10  ;;  %v128_v21 = vadd.f32 %v436_v7, %v94_v13 }
  0x45   :  { %v155_v22 = vmul.f32 %v123_v14, %v55_v48  ;;  %v156_v23 = vmul.f32 %v124_v15, %v56_v56  ;;  %v157_v24 = vmul.f32 %v125_v16, %v57_v50  ;;  %v158_v25 = vmul.f32 %v126_v17, %v58_v51 }
  0x46   :  { %v187_v26 = vadd.f32 %v439_v11, %v153_v18  ;;  %v188_v27 = vadd.f32 %v439_v11, %v154_v19  ;;  %v159_v28 = vmul.f32 %v127_v20, %v59_v58  ;;  %v160_v29 = vmul.f32 %v128_v21, %v60_v59 }
  0x47   :  { %v189_v30 = vadd.f32 %v439_v11, %v155_v22  ;;  %v190_v31 = vadd.f32 %v439_v11, %v156_v23  ;;  %v191_v32 = vadd.f32 %v439_v11, %v157_v24  ;;  %v192_v33 = vadd.f32 %v439_v11, %v158_v25 }
  0x48   :  { %v219_v34 = vmul.f32 %v187_v26, %v53_v46  ;;  %v220_v35 = vmul.f32 %v188_v27, %v54_v47  ;;  %v193_v36 = vadd.f32 %v439_v11, %v159_v28  ;;  %v194_v37 = vadd.f32 %v439_v11, %v160_v29  ;;  %v65_v46 = vld [vmem:[#allocation6 + $0xe0] sm:$0xff]  ;;  %v66_v47 = vld [vmem:[#allocation6 + $0xe8] sm:$0xff] }
  0x49   :  { %v221_v38 = vmul.f32 %v189_v30, %v55_v48  ;;  %v222_v39 = vmul.f32 %v190_v31, %v56_v56  ;;  %v223_v40 = vmul.f32 %v191_v32, %v57_v50  ;;  %v224_v41 = vmul.f32 %v192_v33, %v58_v51  ;;  %v67_v50 = vld [vmem:[#allocation6 + $0xf0] sm:$0xff]  ;;  %v68_v51 = vld [vmem:[#allocation6 + $0xf8] sm:$0xff] }
  0x4a   :  { %v253_v45 = vadd.f32 %v441_v12, %v219_v34  ;;  %v254_v49 = vadd.f32 %v441_v12, %v220_v35  ;;  %v225_v53 = vmul.f32 %v193_v36, %v59_v58  ;;  %v226_v54 = vmul.f32 %v194_v37, %v60_v59 }
  0x4b   :  { %v255_v60 = vadd.f32 %v441_v12, %v221_v38  ;;  %v256_v61 = vadd.f32 %v441_v12, %v222_v39  ;;  %v257_v48 = vadd.f32 %v441_v12, %v223_v40  ;;  %v258_v56 = vadd.f32 %v441_v12, %v224_v41 }
  0x4c   :  { %285 = vst [vmem:[#allocation7 + $0x80] sm:$0xff] %v253_v45  ;;  %286 = vst [vmem:[#allocation7 + $0x88] sm:$0xff] %v254_v49  ;;  %v259_v52 = vadd.f32 %v441_v12, %v225_v53  ;;  %v260_v57 = vadd.f32 %v441_v12, %v226_v54  ;;  %v95_v58 = vmul.f32 %v434_v6, %v61_v42 }
  0x4d   :  { %v96_v59 = vmul.f32 %v434_v6, %v62_v43  ;;  %287 = vst [vmem:[#allocation7 + $0x90] sm:$0xff] %v255_v60  ;;  %288 = vst [vmem:[#allocation7 + $0x98] sm:$0xff] %v256_v61  ;;  %v97_v62 = vmul.f32 %v434_v6, %v63_v44  ;;  %v98_v63 = vmul.f32 %v434_v6, %v64_v55 }
  0x4e   :  { %289 = vst [vmem:[#allocation7 + $0xa0] sm:$0xff] %v257_v48  ;;  %290 = vst [vmem:[#allocation7 + $0xa8] sm:$0xff] %v258_v56  ;;  %v99_v0 = vmul.f32 %v434_v6, %v65_v46  ;;  %v100_v1 = vmul.f32 %v434_v6, %v66_v47  ;;  %v129_v2 = vadd.f32 %v436_v7, %v95_v58 }
  0x4f   :  { %291 = vst [vmem:[#allocation7 + $0xb0] sm:$0xff] %v259_v52  ;;  %292 = vst [vmem:[#allocation7 + $0xb8] sm:$0xff] %v260_v57  ;;  %v130_v3 = vadd.f32 %v436_v7, %v96_v59  ;;  %v101_v4 = vmul.f32 %v434_v6, %v67_v50  ;;  %v102_v5 = vmul.f32 %v434_v6, %v68_v51 }
  0x50   :  { %v131_v8 = vadd.f32 %v436_v7, %v97_v62  ;;  %v132_v9 = vadd.f32 %v436_v7, %v98_v63  ;;  %v133_v10 = vadd.f32 %v436_v7, %v99_v0  ;;  %v134_v13 = vadd.f32 %v436_v7, %v100_v1 }
  0x51   :  { %v161_v14 = vmul.f32 %v129_v2, %v61_v42  ;;  %v162_v15 = vmul.f32 %v130_v3, %v62_v43  ;;  %v135_v16 = vadd.f32 %v436_v7, %v101_v4  ;;  %v136_v17 = vadd.f32 %v436_v7, %v102_v5 }
  0x52   :  { %v163_v18 = vmul.f32 %v131_v8, %v63_v44  ;;  %v164_v19 = vmul.f32 %v132_v9, %v64_v55  ;;  %v165_v20 = vmul.f32 %v133_v10, %v65_v46  ;;  %v166_v21 = vmul.f32 %v134_v13, %v66_v47 }
  0x53   :  { %v195_v6 = vadd.f32 %v439_v11, %v161_v14  ;;  %v196_v22 = vadd.f32 %v439_v11, %v162_v15  ;;  %v167_v23 = vmul.f32 %v135_v16, %v67_v50  ;;  %v168_v24 = vmul.f32 %v136_v17, %v68_v51 }
  0x54   :  { %v197_v25 = vadd.f32 %v439_v11, %v163_v18  ;;  %v198_v26 = vadd.f32 %v439_v11, %v164_v19  ;;  %v199_v27 = vadd.f32 %v439_v11, %v165_v20  ;;  %v200_v28 = vadd.f32 %v439_v11, %v166_v21 }
  0x55   :  { %v227_v29 = vmul.f32 %v195_v6, %v61_v42  ;;  %v228_v7 = vmul.f32 %v196_v22, %v62_v43  ;;  %v201_v30 = vadd.f32 %v439_v11, %v167_v23  ;;  %v202_v31 = vadd.f32 %v439_v11, %v168_v24 }
  0x56   :  { %v229_v32 = vmul.f32 %v197_v25, %v63_v44  ;;  %v230_v33 = vmul.f32 %v198_v26, %v64_v55  ;;  %v231_v34 = vmul.f32 %v199_v27, %v65_v46  ;;  %v232_v35 = vmul.f32 %v200_v28, %v66_v47 }
  0x57   :  { %v261_v36 = vadd.f32 %v441_v12, %v227_v29  ;;  %v262_v37 = vadd.f32 %v441_v12, %v228_v7  ;;  %v233_v38 = vmul.f32 %v201_v30, %v67_v50  ;;  %v234_v39 = vmul.f32 %v202_v31, %v68_v51 }
  0x58   :  { %v263_v40 = vadd.f32 %v441_v12, %v229_v32  ;;  %v264_v41 = vadd.f32 %v441_v12, %v230_v33  ;;  %v265_v42 = vadd.f32 %v441_v12, %v231_v34  ;;  %v266_v11 = vadd.f32 %v441_v12, %v232_v35 }
  0x59   :  { %293 = vst [vmem:[#allocation7 + $0xc0] sm:$0xff] %v261_v36  ;;  %294 = vst [vmem:[#allocation7 + $0xc8] sm:$0xff] %v262_v37  ;;  %v267_v43 = vadd.f32 %v441_v12, %v233_v38  ;;  %v268_v44 = vadd.f32 %v441_v12, %v234_v39 }
  0x5a   :  { %295 = vst [vmem:[#allocation7 + $0xd0] sm:$0xff] %v263_v40  ;;  %296 = vst [vmem:[#allocation7 + $0xd8] sm:$0xff] %v264_v41 }
  0x5b   :  { %297 = vst [vmem:[#allocation7 + $0xe0] sm:$0xff] %v265_v42  ;;  %298 = vst [vmem:[#allocation7 + $0xe8] sm:$0xff] %v266_v11 }
  0x5c   :  { %299 = vst [vmem:[#allocation7 + $0xf0] sm:$0xff] %v267_v43  ;;  %300 = vst [vmem:[#allocation7 + $0xf8] sm:$0xff] %v268_v44 }
  0x5d   :  { %370 = shalt.err (!%p367_p1)
}
  0x5e   :  { %s371_s12 = scalar_lea.hbm %s587_s2, 4096 }
  0x5f   :  { %p372_p2 = scmp.ne.s32.totalorder %s587_s2, %s371_s12  ;;  %p375_p3 = scmp.lt.u32.totalorder %s371_s12, %s587_s2 }
  0x61   :  { %p377_p4 = pnand %p375_p3, %p372_p2 }
  0x63   :  { %380 = shalt.err (!%p377_p4)
}
  0x64   :  { %312 = dma.vmem_to_hbm [thread:$0]  %s307_s8, 4096, %s587_s2, [#allocation4], %s389_s0, %s389_s0, %s390_s29  }
  0x65   :  { %385 = dma.done.wait [#allocation4], 4096  }
  0x66   :  { %386 = vsyncadd [#allocation4], 4294963200 }
  0x67   :  { %316 = vsyncpa [#allocation3], 1 }
  0x68   :  { %317 = vsyncpa [#allocation4], 1 }
  0x69   :  { %318 = vsyncpa [#allocation5], 1 }

</bundles_post_ra>
